<compile_context>
chip_gen: v7x
topology: tpu7x:2x2x1
jax: 0.10.0
libtpu: 0.0.40
codegen_flags: <defaults>
</compile_context>

<pallas_src>
import math

import jax
import jax.numpy as jnp
from jax.experimental import pallas as pl
from jax.experimental.pallas import tpu as pltpu

BN_EPS = 1e-5     # torch.nn.BatchNorm1d default eps
DEG_EPS = 1e-7    # epsilon used in the module's degree normalization
MXU_DTYPE = jnp.bfloat16  # MXU input dtype (accumulation stays f32)


def _gcn_kernel(a_ref, x_ref, w1_ref, b1_ref, s1_ref, t1_ref,
                w2_ref, b2_ref, s2_ref, t2_ref, o_ref):
    a = a_ref[...]                                    # (Bb, N, N)  f32
    x = x_ref[...]                                    # (Bb, N, F_in) f32

    # Degrees of A_hat = A + I without materializing the identity.
    deg = jnp.sum(a, axis=-1, keepdims=True) + 1.0    # (Bb, N, 1)
    dis = jax.lax.rsqrt(deg + DEG_EPS)                # (Bb, N, 1)

    # A_norm @ X == dis * (A @ (dis * X) + dis * X)
    xs = dis * x                                      # (Bb, N, F_in)
    agg = jnp.einsum(
        "bij,bjf->bif",
        a.astype(MXU_DTYPE), xs.astype(MXU_DTYPE),
        preferred_element_type=jnp.float32)
    h = dis * (agg + xs)                              # (Bb, N, F_in)

    # MLP on a flattened (Bb*N, .) slab: one lane-dense matmul per layer.
    bb, n, f = h.shape
    h = h.reshape(bb * n, f)

    # Linear(input_dim, hidden) + ReLU + fused BatchNorm1d (eval)
    h = jnp.dot(h.astype(MXU_DTYPE), w1_ref[...].astype(MXU_DTYPE),
                preferred_element_type=jnp.float32) + b1_ref[...]
    h = jnp.maximum(h, 0.0)
    h = h * s1_ref[...] + t1_ref[...]

    # Linear(hidden, hidden) + ReLU + fused BatchNorm1d (eval)
    h = jnp.dot(h.astype(MXU_DTYPE), w2_ref[...].astype(MXU_DTYPE),
                preferred_element_type=jnp.float32) + b2_ref[...]
    h = jnp.maximum(h, 0.0)
    h = h * s2_ref[...] + t2_ref[...]

    o_ref[...] = h.astype(o_ref.dtype)


def _pick_block_b(B, N, target_rows=256):
    """Largest divisor of B keeping the MXU M-dim near `target_rows`, with >=2 grid steps."""
    best = 1
    for bb in range(1, B + 1):
        if B % bb == 0 and bb * N <= max(target_rows, N):
            best = bb
    if best == B and B >= 2:  # keep >= 2 blocks so both v7x TensorCores get work
        best = max(d for d in range(1, B) if B % d == 0)
    return best


def gcn_forward(A, X, params, *, block_b=None):
    A = jnp.asarray(A, jnp.float32)
    X = jnp.asarray(X, jnp.float32)
    B, N, _ = A.shape
    F_in = X.shape[-1]
    H = params["w1"].shape[1]
    H_pad = pl.cdiv(H, 128) * 128                     # lane-dense hidden width

    if block_b is None:
        block_b = _pick_block_b(B, N)
    assert B % block_b == 0, "block_b must divide B"
    rows = block_b * N
    assert rows % 8 == 0 or block_b == B, "block rows must be sublane-aligned"
    grid_b = B // block_b

    f32 = jnp.float32
    # Zero-pad weights/biases to the lane-dense hidden width (padded lanes stay inert
    # because the padded rows of w2 are zero; padded output lanes are sliced off below).
    w1p = jnp.zeros((F_in, H_pad), f32).at[:, :H].set(params["w1"].astype(f32))
    b1p = jnp.zeros((1, H_pad), f32).at[:, :H].set(params["b1"].reshape(1, H).astype(f32))
    w2p = jnp.zeros((H_pad, H_pad), f32).at[:H, :H].set(params["w2"].astype(f32))
    b2p = jnp.zeros((1, H_pad), f32).at[:, :H].set(params["b2"].reshape(1, H).astype(f32))

    # Fused eval-mode BatchNorm1d (channel = node dim N): y = y * scale + shift,
    # tiled across the batch so the kernel needs no reshape / strided slicing.
    def fused_bn(gamma, beta, mean, var):
        scale = gamma.astype(f32) * jax.lax.rsqrt(var.astype(f32) + BN_EPS)
        shift = beta.astype(f32) - mean.astype(f32) * scale
        scale = jnp.tile(scale.reshape(N, 1), (B, 1))   # (B*N, 1)
        shift = jnp.tile(shift.reshape(N, 1), (B, 1))   # (B*N, 1)
        return scale, shift

    s1, t1 = fused_bn(params["gamma1"], params["beta1"], params["mean1"], params["var1"])
    s2, t2 = fused_bn(params["gamma2"], params["beta2"], params["mean2"], params["var2"])

    flops = 2 * B * N * (N * F_in + F_in * H_pad + H_pad * H_pad)
    bytes_accessed = 4 * (A.size + X.size + B * N * H_pad
                          + w1p.size + w2p.size + b1p.size + b2p.size
                          + s1.size + t1.size + s2.size + t2.size)

    out = pl.pallas_call(
        _gcn_kernel,
        out_shape=jax.ShapeDtypeStruct((B * N, H_pad), jnp.float32),
        grid_spec=pltpu.PrefetchScalarGridSpec(
            num_scalar_prefetch=0,
            grid=(grid_b,),
            in_specs=[
                pl.BlockSpec((block_b, N, N), lambda b: (b, 0, 0)),      # A
                pl.BlockSpec((block_b, N, F_in), lambda b: (b, 0, 0)),   # X
                pl.BlockSpec((F_in, H_pad), lambda b: (0, 0)),           # W1 (resident)
                pl.BlockSpec((1, H_pad), lambda b: (0, 0)),              # b1
                pl.BlockSpec((rows, 1), lambda b: (b, 0)),               # BN1 scale
                pl.BlockSpec((rows, 1), lambda b: (b, 0)),               # BN1 shift
                pl.BlockSpec((H_pad, H_pad), lambda b: (0, 0)),          # W2 (resident)
                pl.BlockSpec((1, H_pad), lambda b: (0, 0)),              # b2
                pl.BlockSpec((rows, 1), lambda b: (b, 0)),               # BN2 scale
                pl.BlockSpec((rows, 1), lambda b: (b, 0)),               # BN2 shift
            ],
            out_specs=pl.BlockSpec((rows, H_pad), lambda b: (b, 0)),     # lane-dense slab
        ),
        compiler_params=pltpu.CompilerParams(
            dimension_semantics=("parallel",),
            vmem_limit_bytes=32 * 1024 * 1024,
        ),
        cost_estimate=pl.CostEstimate(
            flops=flops, transcendentals=B * N, bytes_accessed=bytes_accessed),
    )(A, X, w1p, b1p, s1, t1, w2p, b2p, s2, t2)

    return out.reshape(B, N, H_pad)[:, :, :H]


def gcn_reference(A, X, params):
    """Pure-JAX f32 reference with the PyTorch module's (eval-mode) semantics."""
    B, N, _ = A.shape
    eye = jnp.eye(N, dtype=A.dtype)[None]
    a_hat = A + eye
    d = jnp.sum(a_hat, axis=2, keepdims=True)
    dis = jnp.power(d + DEG_EPS, -0.5)
    a_norm = dis * a_hat * jnp.swapaxes(dis, 1, 2)
    h = a_norm @ X

    def bn(h, g, be, m, v):
        g, be = g.reshape(1, N, 1), be.reshape(1, N, 1)
        m, v = m.reshape(1, N, 1), v.reshape(1, N, 1)
        return (h - m) * jax.lax.rsqrt(v + BN_EPS) * g + be

    h = jnp.maximum(h @ params["w1"] + params["b1"].reshape(1, 1, -1), 0.0)
    h = bn(h, params["gamma1"], params["beta1"], params["mean1"], params["var1"])
    h = jnp.maximum(h @ params["w2"] + params["b2"].reshape(1, 1, -1), 0.0)
    h = bn(h, params["gamma2"], params["beta2"], params["mean2"], params["var2"])
    return h


if __name__ == "__main__":
    # batch=8 graphs, nodes (= batchnorm_dim) = 8, input_dim = 16, hidden_dim = 32
    B, N, F_in, H = 8, 8, 16, 32

    key = jax.random.PRNGKey(0)
    ks = jax.random.split(key, 14)

    A = (jax.random.uniform(ks[0], (B, N, N)) > 0.5).astype(jnp.float32)
    X = jax.random.normal(ks[1], (B, N, F_in), dtype=jnp.float32)

    def uinit(k, shape, fan_in):
        bound = 1.0 / math.sqrt(fan_in)
        return jax.random.uniform(k, shape, minval=-bound, maxval=bound).astype(jnp.float32)

    params = {
        "w1": uinit(ks[2], (F_in, H), F_in),
        "b1": uinit(ks[3], (H,), F_in),
        "w2": uinit(ks[4], (H, H), H),
        "b2": uinit(ks[5], (H,), H),
        "gamma1": (1.0 + 0.1 * jax.random.normal(ks[6], (N,))).astype(jnp.float32),
        "beta1": (0.1 * jax.random.normal(ks[7], (N,))).astype(jnp.float32),
        "mean1": (0.05 * jax.random.normal(ks[8], (N,))).astype(jnp.float32),
        "var1": (1.0 + 0.1 * jax.random.uniform(ks[9], (N,))).astype(jnp.float32),
        "gamma2": (1.0 + 0.1 * jax.random.normal(ks[10], (N,))).astype(jnp.float32),
        "beta2": (0.1 * jax.random.normal(ks[11], (N,))).astype(jnp.float32),
        "mean2": (0.05 * jax.random.normal(ks[12], (N,))).astype(jnp.float32),
        "var2": (1.0 + 0.1 * jax.random.uniform(ks[13], (N,))).astype(jnp.float32),
    }

    out = jax.block_until_ready(gcn_forward(A, X, params))
    ref = gcn_reference(A, X, params)

    assert out.shape == (B, N, H)
    # bf16 MXU inputs (f32 accumulation) => compare against the f32 reference
    # with a correspondingly loosened tolerance.
    assert jnp.allclose(out, ref, atol=5e-2, rtol=5e-2), "mismatch vs pure-JAX reference"

    print("KERNEL_OK")
</pallas_src>

<mosaic_0001>
module attributes {stable_mosaic.version = 11 : i64} {
  func.func @_gcn_kernel(%arg0: i32, %arg1: memref<4x8x8xf32, #tpu.memory_space<vmem>>, %arg2: memref<4x8x16xf32, #tpu.memory_space<vmem>>, %arg3: memref<16x128xf32, #tpu.memory_space<vmem>>, %arg4: memref<1x128xf32, #tpu.memory_space<vmem>>, %arg5: memref<32x1xf32, #tpu.memory_space<vmem>>, %arg6: memref<32x1xf32, #tpu.memory_space<vmem>>, %arg7: memref<128x128xf32, #tpu.memory_space<vmem>>, %arg8: memref<1x128xf32, #tpu.memory_space<vmem>>, %arg9: memref<32x1xf32, #tpu.memory_space<vmem>>, %arg10: memref<32x1xf32, #tpu.memory_space<vmem>>, %arg11: memref<32x128xf32, #tpu.memory_space<vmem>>) attributes {dimension_semantics = [#tpu.dimension_semantics<parallel>], iteration_bounds = array<i64: 2>, scalar_prefetch = 0 : i64, scratch_operands = 0 : i64, tpu.core_type = #tpu.core_type<tc>, window_params = [{transform_indices = @transform_0, window_bounds = array<i64: 4, 8, 8>}, {transform_indices = @transform_1, window_bounds = array<i64: 4, 8, 16>}, {pipeline_mode = #tpu.pipeline_mode<synchronous>, transform_indices = @transform_2, window_bounds = array<i64: 16, 128>}, {pipeline_mode = #tpu.pipeline_mode<synchronous>, transform_indices = @transform_3, window_bounds = array<i64: 1, 128>}, {transform_indices = @transform_4, window_bounds = array<i64: 32, 1>}, {transform_indices = @transform_5, window_bounds = array<i64: 32, 1>}, {pipeline_mode = #tpu.pipeline_mode<synchronous>, transform_indices = @transform_6, window_bounds = array<i64: 128, 128>}, {pipeline_mode = #tpu.pipeline_mode<synchronous>, transform_indices = @transform_7, window_bounds = array<i64: 1, 128>}, {transform_indices = @transform_8, window_bounds = array<i64: 32, 1>}, {transform_indices = @transform_9, window_bounds = array<i64: 32, 1>}, {transform_indices = @transform_10, window_bounds = array<i64: 32, 128>}]} {
    %c0 = arith.constant 0 : index
    %c0_0 = arith.constant 0 : index
    %c0_1 = arith.constant 0 : index
    %0 = vector.load %arg1[%c0, %c0_0, %c0_1] : memref<4x8x8xf32, #tpu.memory_space<vmem>>, vector<4x8x8xf32>
    %c0_2 = arith.constant 0 : index
    %c0_3 = arith.constant 0 : index
    %c0_4 = arith.constant 0 : index
    %1 = vector.load %arg2[%c0_2, %c0_3, %c0_4] : memref<4x8x16xf32, #tpu.memory_space<vmem>>, vector<4x8x16xf32>
    %cst = arith.constant dense<0.000000e+00> : vector<4x8xf32>
    %2 = vector.multi_reduction <add>, %0, %cst [2] : vector<4x8x8xf32> to vector<4x8xf32>
    %3 = vector.shape_cast %2 : vector<4x8xf32> to vector<4x8x1xf32>
    %cst_5 = arith.constant 1.000000e+00 : f32
    %4 = vector.broadcast %cst_5 : f32 to vector<4x8x1xf32>
    %5 = arith.addf %3, %4 : vector<4x8x1xf32>
    %cst_6 = arith.constant 1.000000e-07 : f32
    %6 = vector.broadcast %cst_6 : f32 to vector<4x8x1xf32>
    %7 = arith.addf %5, %6 : vector<4x8x1xf32>
    %8 = math.rsqrt %7 : vector<4x8x1xf32>
    %9 = vector.broadcast %8 : vector<4x8x1xf32> to vector<4x8x16xf32>
    %10 = arith.mulf %9, %1 : vector<4x8x16xf32>
    %11 = arith.truncf %0 : vector<4x8x8xf32> to vector<4x8x8xbf16>
    %12 = arith.truncf %10 : vector<4x8x16xf32> to vector<4x8x16xbf16>
    "tpu.trace_start"() <{level = 10 : i32, message = "bij,bjf->bif"}> : () -> ()
    %cst_7 = arith.constant dense<0.000000e+00> : vector<4x8x16xf32>
    %13 = tpu.matmul %11, %12, %cst_7 {dimension_numbers = #tpu.dot_dimension_numbers<[2], [1], [1], [2], [0, 0, 0, 1, 1, 2], [0], [0]>} : vector<4x8x8xbf16>, vector<4x8x16xbf16>, vector<4x8x16xf32> -> vector<4x8x16xf32>
    "tpu.trace_stop"() : () -> ()
    %14 = arith.addf %13, %10 : vector<4x8x16xf32>
    %15 = vector.broadcast %8 : vector<4x8x1xf32> to vector<4x8x16xf32>
    %16 = arith.mulf %15, %14 : vector<4x8x16xf32>
    %17 = vector.shape_cast %16 : vector<4x8x16xf32> to vector<32x16xf32>
    %18 = arith.truncf %17 : vector<32x16xf32> to vector<32x16xbf16>
    %c0_8 = arith.constant 0 : index
    %c0_9 = arith.constant 0 : index
    %19 = vector.load %arg3[%c0_8, %c0_9] : memref<16x128xf32, #tpu.memory_space<vmem>>, vector<16x128xf32>
    %20 = arith.truncf %19 : vector<16x128xf32> to vector<16x128xbf16>
    %cst_10 = arith.constant dense<0.000000e+00> : vector<32x128xf32>
    %21 = tpu.matmul %18, %20, %cst_10 {dimension_numbers = #tpu.dot_dimension_numbers<[1], [0], [0], [1], [0, 0, 1, 1], [], []>} : vector<32x16xbf16>, vector<16x128xbf16>, vector<32x128xf32> -> vector<32x128xf32>
    %c0_11 = arith.constant 0 : index
    %c0_12 = arith.constant 0 : index
    %22 = vector.load %arg4[%c0_11, %c0_12] : memref<1x128xf32, #tpu.memory_space<vmem>>, vector<1x128xf32>
    %23 = vector.broadcast %22 : vector<1x128xf32> to vector<32x128xf32>
    %24 = arith.addf %21, %23 : vector<32x128xf32>
    %cst_13 = arith.constant 0.000000e+00 : f32
    %25 = vector.broadcast %cst_13 : f32 to vector<32x128xf32>
    %26 = arith.maximumf %24, %25 : vector<32x128xf32>
    %c0_14 = arith.constant 0 : index
    %c0_15 = arith.constant 0 : index
    %27 = vector.load %arg5[%c0_14, %c0_15] : memref<32x1xf32, #tpu.memory_space<vmem>>, vector<32x1xf32>
    %28 = vector.broadcast %27 : vector<32x1xf32> to vector<32x128xf32>
    %29 = arith.mulf %26, %28 : vector<32x128xf32>
    %c0_16 = arith.constant 0 : index
    %c0_17 = arith.constant 0 : index
    %30 = vector.load %arg6[%c0_16, %c0_17] : memref<32x1xf32, #tpu.memory_space<vmem>>, vector<32x1xf32>
    %31 = vector.broadcast %30 : vector<32x1xf32> to vector<32x128xf32>
    %32 = arith.addf %29, %31 : vector<32x128xf32>
    %33 = arith.truncf %32 : vector<32x128xf32> to vector<32x128xbf16>
    %c0_18 = arith.constant 0 : index
    %c0_19 = arith.constant 0 : index
    %34 = vector.load %arg7[%c0_18, %c0_19] : memref<128x128xf32, #tpu.memory_space<vmem>>, vector<128x128xf32>
    %35 = arith.truncf %34 : vector<128x128xf32> to vector<128x128xbf16>
    %cst_20 = arith.constant dense<0.000000e+00> : vector<32x128xf32>
    %36 = tpu.matmul %33, %35, %cst_20 {dimension_numbers = #tpu.dot_dimension_numbers<[1], [0], [0], [1], [0, 0, 1, 1], [], []>} : vector<32x128xbf16>, vector<128x128xbf16>, vector<32x128xf32> -> vector<32x128xf32>
    %c0_21 = arith.constant 0 : index
    %c0_22 = arith.constant 0 : index
    %37 = vector.load %arg8[%c0_21, %c0_22] : memref<1x128xf32, #tpu.memory_space<vmem>>, vector<1x128xf32>
    %38 = vector.broadcast %37 : vector<1x128xf32> to vector<32x128xf32>
    %39 = arith.addf %36, %38 : vector<32x128xf32>
    %cst_23 = arith.constant 0.000000e+00 : f32
    %40 = vector.broadcast %cst_23 : f32 to vector<32x128xf32>
    %41 = arith.maximumf %39, %40 : vector<32x128xf32>
    %c0_24 = arith.constant 0 : index
    %c0_25 = arith.constant 0 : index
    %42 = vector.load %arg9[%c0_24, %c0_25] : memref<32x1xf32, #tpu.memory_space<vmem>>, vector<32x1xf32>
    %43 = vector.broadcast %42 : vector<32x1xf32> to vector<32x128xf32>
    %44 = arith.mulf %41, %43 : vector<32x128xf32>
    %c0_26 = arith.constant 0 : index
    %c0_27 = arith.constant 0 : index
    %45 = vector.load %arg10[%c0_26, %c0_27] : memref<32x1xf32, #tpu.memory_space<vmem>>, vector<32x1xf32>
    %46 = vector.broadcast %45 : vector<32x1xf32> to vector<32x128xf32>
    %47 = arith.addf %44, %46 : vector<32x128xf32>
    %c0_28 = arith.constant 0 : index
    %c0_29 = arith.constant 0 : index
    %48 = vector.load %arg11[%c0_28, %c0_29] : memref<32x128xf32, #tpu.memory_space<vmem>>, vector<32x128xf32>
    tpu.vector_store %arg11[%c0_28, %c0_29], %47 {strides = array<i32>} : memref<32x128xf32, #tpu.memory_space<vmem>>, vector<32x128xf32>,
    return
  }
  func.func @transform_0(%arg0: i32) -> (i32, i32, i32) {
    %c0_i32 = arith.constant 0 : i32
    %c0_i32_0 = arith.constant 0 : i32
    %c0_i32_1 = arith.constant 0 : i32
    return %arg0, %c0_i32, %c0_i32_0 : i32, i32, i32
  }
  func.func @transform_1(%arg0: i32) -> (i32, i32, i32) {
    %c0_i32 = arith.constant 0 : i32
    %c0_i32_0 = arith.constant 0 : i32
    %c0_i32_1 = arith.constant 0 : i32
    return %arg0, %c0_i32, %c0_i32_0 : i32, i32, i32
  }
  func.func @transform_2(%arg0: i32) -> (i32, i32) {
    %c0_i32 = arith.constant 0 : i32
    %c0_i32_0 = arith.constant 0 : i32
    %c0_i32_1 = arith.constant 0 : i32
    return %c0_i32, %c0_i32_0 : i32, i32
  }
  func.func @transform_3(%arg0: i32) -> (i32, i32) {
    %c0_i32 = arith.constant 0 : i32
    %c0_i32_0 = arith.constant 0 : i32
    %c0_i32_1 = arith.constant 0 : i32
    return %c0_i32, %c0_i32_0 : i32, i32
  }
  func.func @transform_4(%arg0: i32) -> (i32, i32) {
    %c0_i32 = arith.constant 0 : i32
    %c0_i32_0 = arith.constant 0 : i32
    return %arg0, %c0_i32 : i32, i32
  }
  func.func @transform_5(%arg0: i32) -> (i32, i32) {
    %c0_i32 = arith.constant 0 : i32
    %c0_i32_0 = arith.constant 0 : i32
    return %arg0, %c0_i32 : i32, i32
  }
  func.func @transform_6(%arg0: i32) -> (i32, i32) {
    %c0_i32 = arith.constant 0 : i32
    %c0_i32_0 = arith.constant 0 : i32
    %c0_i32_1 = arith.constant 0 : i32
    return %c0_i32, %c0_i32_0 : i32, i32
  }
  func.func @transform_7(%arg0: i32) -> (i32, i32) {
    %c0_i32 = arith.constant 0 : i32
    %c0_i32_0 = arith.constant 0 : i32
    %c0_i32_1 = arith.constant 0 : i32
    return %c0_i32, %c0_i32_0 : i32, i32
  }
  func.func @transform_8(%arg0: i32) -> (i32, i32) {
    %c0_i32 = arith.constant 0 : i32
    %c0_i32_0 = arith.constant 0 : i32
    return %arg0, %c0_i32 : i32, i32
  }
  func.func @transform_9(%arg0: i32) -> (i32, i32) {
    %c0_i32 = arith.constant 0 : i32
    %c0_i32_0 = arith.constant 0 : i32
    return %arg0, %c0_i32 : i32, i32
  }
  func.func @transform_10(%arg0: i32) -> (i32, i32) {
    %c0_i32 = arith.constant 0 : i32
    %c0_i32_0 = arith.constant 0 : i32
    return %arg0, %c0_i32 : i32, i32
  }
}

</mosaic_0001>

<bundles_post_ra>
// kernel: tpu_custom_call.1
= control target key start
LH: loop header
LB: loop body
LE: loop exit
PB: predicated region body
PF: predicated region fallthrough
CT: control target
= control target key end

     0   :  { %15 = vsyncpa [#allocation3], 0  ;;  %s1759_s0 = inlined_call_operand.vmem [shape: f32[8,8,8], index: 0, kind: input, shape index: {}]   ;;  %s1760_s1 = inlined_call_operand.vmem [shape: f32[8,8,16], index: 1, kind: input, shape index: {}]   ;;  %s1761_s2 = inlined_call_operand.hbm [shape: f32[16,128], index: 2, kind: input, shape index: {}]   ;;  %s1762_s3 = inlined_call_operand.vmem [shape: f32[1,128], index: 3, kind: input, shape index: {}]   ;;  %s1763_s4 = inlined_call_operand.vmem [shape: f32[64,1], index: 4, kind: input, shape index: {}]   ;;  %s1764_s5 = inlined_call_operand.vmem [shape: f32[64,1], index: 5, kind: input, shape index: {}]   ;;  %s1765_s6 = inlined_call_operand.vmem [shape: f32[128,128], index: 6, kind: input, shape index: {}]   ;;  %s1766_s7 = inlined_call_operand.vmem [shape: f32[1,128], index: 7, kind: input, shape index: {}]   ;;  %s1767_s8 = inlined_call_operand.vmem [shape: f32[64,1], index: 8, kind: input, shape index: {}]   ;;  %s1768_s9 = inlined_call_operand.vmem [shape: f32[64,1], index: 9, kind: input, shape index: {}]   ;;  %s1769_s10 = inlined_call_operand.hbm [shape: f32[64,128], index: 10, kind: output, shape index: {}]  }
   0x1   :  { %16 = vsyncpa [#allocation4], 0 }
   0x2   :  { %18 = vsyncpa [#allocation4 + $0x1], 0  ;;  %s1474_s13 = smov 0   ;;  %s1476_s14 = smov 0  }
   0x3   :  { %s1478_s15 = smov 0   ;;  %s1480_s16 = smov 0  }
   0x4 LB: > { %s1495_s17 = sadd.s32 4294967295, %s1408_s16   ;;  %s1143_s18 = sadd.s32 4294967294, %s1408_s16   ;;  %s1408_s16 = sphi %s1480_s16, %s1785_s16   ;;  %s1404_s15 = sphi %s1478_s15, %s1784_s15   ;;  %s1400_s14 = sphi %s1476_s14, %s1783_s14   ;;  %s1396_s13 = sphi %s1474_s13, %s1782_s13  }
   0x5   : > { %s1499_s19 = sadd.s32 1, %s1408_s16   ;;  %s271_s20 = sadd.s32 1, %s1404_s15 }
   0x6   : > { %s268_s21 = ssub.s32 %s1408_s16, %s1499_s19  ;;  %p281_p0 = scmp.ne.s32.totalorder %s1404_s15, %s1400_s14 }
   0x7   : > { %p269_p1 = scmp.eq.s32.totalorder %s268_s21, 0  ;;  %p282_p2 = scmp.eq.s32.totalorder %s1495_s17, 1 }
   0x8   : > { %p287_p3 = scmp.ne.s32.totalorder %s1400_s14, %s1396_s13  ;;  %p288_p4 = scmp.eq.s32.totalorder %s1143_s18, 1 }
   0x9   : > { %s1510_s22 = scalar_select %p269_p1, %s1404_s15, %s271_s20  }
   0xa   : > { %p1512_p5 = por %p282_p2, %p281_p0  ;;  %p1516_p6 = por %p288_p4, %p287_p3 }
   0xb   : > { %p1144_p7 = scmp.ge.s32.totalorder %s1408_s16, 1  ;;  %p295_p8 = scmp.lt.s32.totalorder %s1408_s16, 3 }
   0xc   : > { %s1773_s23 = scalar_select %p1512_p5, 1, 0 }
   0xd   : > { %s1774_s24 = scalar_select %p1516_p6, 1, 0 }
   0xe   : > { %p1770_p9 = scmp.eq.s32.totalorder %s1495_s17, 0  ;;  %p1523_p10 = pnand %p1144_p7, %p295_p8 }
   0xf   : > { %s1410_s26 = smov [#allocation2]   ;;  %s1314_s11 = scalar_lea.hbm %s1761_s2, 256 }
  0x10   : > { %s1775_s25 = scalar_select %p1523_p10, 1, 0 }
  0x11   : > { %s307_s27 = sshll.u32 %s1410_s26, 4  ;;  %p1253_p11 = pneg %p1523_p10  ;;  %s308_s27 = int_to_ptr.vmem [resolvable:$true] %s307_s27 }
  0x12   : > { %p1315_p13 = scmp.ne.s32.totalorder %s1761_s2, %s1314_s11  ;;  %p1321_p3 = scmp.lt.u32.totalorder %s1314_s11, %s1761_s2 }
  0x13   : > { %p1531_p12 = pnand %p1770_p9, %p1253_p11 }
  0x15   : > { %p1316_p0 = pneg %p1531_p12 }
  0x17   : > { %p1317_p1 = pnand %p1316_p0, %p1315_p13 }
  0x19   : > { %p1318_p2 = pneg %p1317_p1 }
  0x1b   : > { %p1323_p4 = pnand %p1321_p3, %p1318_p2 }
  0x1d   : > { %1326 = shalt.err (!%p1323_p4)
}
  0x1e   : > { %s1327_s26 = scalar_lea.vmem %s308_s27, 256  ;;  %p1335_p9 = scmp.lt.s32.totalorder %s308_s27, %s308_s27 }
  0x1f   : > { %p1328_p7 = scmp.ne.s32.totalorder %s308_s27, %s1327_s26  ;;  %p1336_p6 = scmp.lt.s32.totalorder %s1327_s26, %s1327_s26 }
  0x21   : > { %p1330_p8 = pnand %p1328_p7, %p1316_p0  ;;  %p1337_p5 = por %p1336_p6, %p1335_p9 }
  0x23   : > { %p1331_p11 = pneg %p1330_p8 }
  0x25   : > { %p1338_p10 = pnand %p1337_p5, %p1331_p11 }
  0x27   : > { %1341 = shalt.err (!%p1338_p10)
}
  0x28   : > { %s1411_s29 = smov 128   ;;  %s1412_s30 = smov 8  }
  0x29   : > { %1256 = dma.hbm_to_vmem [thread:$0]  (!%p1531_p12), %s1761_s2, 256, %s308_s27, [#allocation3], %s1411_s29, %s1411_s29, %s1412_s30  }
  0x2a   : > { %p1777_p13 = scmp.ne.s32.totalorder %s1775_s25, 0 }
  0x2b   : > { %p1778_p1 = scmp.eq.s32.totalorder (!%p1777_p13), %s1495_s17, 0 }
  0x2c   : > { %386 = sbr.rel (%p1777_p13) target bundleno = 923 (0x39b), region = 60 }
  0x33   : > { %1387 = dma.done.wait (%p1778_p1), [#allocation3], 256   ;;  %p1779_p0 = pmov %p1778_p1 }
  0x34   : > { %s1150_s11 = sshll.u32 %s1495_s17, 2  ;;  %vm495_vm0 = vcmask 64512   ;;  %v1413_v8 = vmov 0.0   ;;  %vm1414_vm1 = vmmov 0   ;;  %vm535_vm2 = vcmask 1043456   ;;  %v723_v45 = vld [vmem:[#allocation2] sm:$0xff] }
  0x35   : > { %1389 = vsyncadd (%p1779_p0), [#allocation3], 4294967040  ;;  %p450_p5 = scmp.lt.s32.totalorder %s1150_s11, 7  ;;  %1197 = vmatprep.subr.bf16.mxu0 %v1413_v8  ;;  %1215 = vmatprep.subr.bf16.mxu1 %v1413_v8  ;;  %v724_v46 = vld [vmem:[#allocation2 + $0x8] sm:$0xff]  ;;  %v1415_v48 = vmov 0   ;;  %v851_v63 = vld [vmem:[%s1765_s6] sm:$0xff] }
  0x36   : > { %1199 = vmatprep.mubr.msk.bf16.mxu0 %vm1414_vm1, %v1413_v8  ;;  %1217 = vmatprep.mubr.msk.bf16.mxu1 %vm1414_vm1, %v1413_v8  ;;  %v725_v47 = vpack.c.bf16 %v724_v46, %v723_v45  ;;  %vm733_vm3 = vcmask 130048   ;;  %p1780_p9 = scmp.ne.s32.totalorder %s1773_s23, 0 }
  0x37   : > { %s1787_s11 = smov (!%p450_p5, %s1150_s11), 7  ;;  %1305 = vset.pattern.permute.xlu1 %v1415_v48  ;;  %1304 = vset.pattern.permute.xlu0 %v1415_v48  ;;  %v865_v48 = vld [vmem:[%s1765_s6 + $0x70] sm:$0xff] }
  0x38   : > { %s1558_s20 = sshll.u32 %s1787_s11, 3 }
  0x39   : > { %s453_s27 = scalar_lea.vmem %s1759_s0, %s1558_s20  ;;  %s459_s29 = scalar_lea.vmem %s1760_s1, %s1558_s20 }
  0x3a   : > { %v1564_v0 = vld [vmem:[%s453_s27 + $0x10] sm:$0xff]  ;;  %v487_v1 = vld [vmem:[%s453_s27] sm:$0xff]  ;;  %v1566_v2 = vld [vmem:[%s453_s27 + $0x18] sm:$0xff]  ;;  %s465_s18 = scalar_lea.vmem %s1763_s4, %s1558_s20  ;;  %s477_s21 = scalar_lea.vmem %s1767_s8, %s1558_s20 }
  0x3b   : > { %v502_v3 = vsel %vm495_vm0, %v1564_v0, 0.0  ;;  %v496_v4 = vsel %vm495_vm0, %v487_v1, 0.0  ;;  %v1571_v5 = vld [vmem:[%s453_s27 + $0x8] sm:$0xff]  ;;  %v505_v6 = vsel %vm495_vm0, %v1566_v2, 0.0  ;;  %v491_v21 = vld [vmem:[%s459_s29] sm:$0xff]  ;;  %v494_v24 = vld [vmem:[%s459_s29 + $0x18] sm:$0xff]  ;;  %v524_v32 = vpack.c.bf16 %v487_v1, %v487_v1  ;;  %s471_s26 = scalar_lea.vmem %s1764_s5, %s1558_s20  ;;  %s483_s12 = scalar_lea.vmem %s1768_s9, %s1558_s20 }
  0x3c   : > { %503 = vadd.xlane.f32.xlu1 %v502_v3  ;;  %497 = vadd.xlane.f32.xlu0 %v496_v4  ;;  %v499_v7 = vsel %vm495_vm0, %v1571_v5, 0.0  ;;  %v492_v26 = vld [vmem:[%s459_s29 + $0x8] sm:$0xff]  ;;  %v493_v31 = vld [vmem:[%s459_s29 + $0x10] sm:$0xff]  ;;  %v527_v38 = vpack.c.bf16 %v1566_v2, %v1566_v2  ;;  %v525_v42 = vpack.c.bf16 %v1571_v5, %v1571_v5  ;;  %v526_v44 = vpack.c.bf16 %v1564_v0, %v1564_v0  ;;  %v793_v51 = vld [vmem:[%s465_s18] sm:$0xff]  ;;  %s446_s27 = sand.u32 1, %s1400_s14   ;;  %s1175_s29 = sshll.u32 %s1495_s17, 9 }
  0x3d   : > { %v794_v49 = vld [vmem:[%s465_s18 + $0x8] sm:$0xff]  ;;  %v795_v50 = vld [vmem:[%s465_s18 + $0x10] sm:$0xff]  ;;  %v796_v53 = vld [vmem:[%s465_s18 + $0x18] sm:$0xff]  ;;  %s1149_s25 = sshll.u32 %s446_s27, 5  ;;  %s1714_s18 = scalar_lea.hbm %s1769_s10, %s1175_s29 }
  0x3e   : > { %v936_v52 = vld [vmem:[%s477_s21 + $0x8] sm:$0xff]  ;;  %v938_v54 = vld [vmem:[%s477_s21 + $0x18] sm:$0xff]  ;;  %v821_v55 = vld [vmem:[%s471_s26] sm:$0xff]  ;;  %s1718_s17 = scalar_lea.sflag [#allocation4], %s446_s27  ;;  %s1416_s20 = smov [#allocation5]  }
  0x3f   : > { %v964_v56 = vld [vmem:[%s483_s12 + $0x8] sm:$0xff]  ;;  %v966_v58 = vld [vmem:[%s483_s12 + $0x18] sm:$0xff]  ;;  %v823_v59 = vld [vmem:[%s471_s26 + $0x10] sm:$0xff]  ;;  %s1346_s28 = sshll.u32 %s1416_s20, 4  ;;  %s1347_s28 = int_to_ptr.vmem [resolvable:$false] %s1346_s28 }
  0x40   : > { %506 = vadd.xlane.f32.xlu1 %v505_v6  ;;  %500 = vadd.xlane.f32.xlu0 %v499_v7  ;;  %v822_v57 = vld [vmem:[%s471_s26 + $0x8] sm:$0xff]  ;;  %v824_v60 = vld [vmem:[%s471_s26 + $0x18] sm:$0xff]  ;;  %v935_v61 = vld [vmem:[%s477_s21] sm:$0xff] }
  0x41   : > { %v937_v62 = vld [vmem:[%s477_s21 + $0x10] sm:$0xff]  ;;  %v852_v0 = vld [vmem:[%s1765_s6 + $0x8] sm:$0xff]  ;;  %v963_v2 = vld [vmem:[%s483_s12] sm:$0xff] }
  0x42   : > { %v867_v1 = vpack.c.bf16 %v852_v0, %v851_v63  ;;  %v853_v3 = vld [vmem:[%s1765_s6 + $0x10] sm:$0xff]  ;;  %v854_v4 = vld [vmem:[%s1765_s6 + $0x18] sm:$0xff]  ;;  %v855_v7 = vld [vmem:[%s1765_s6 + $0x20] sm:$0xff] }
  0x43   : > { %v868_v5 = vpack.c.bf16 %v854_v4, %v853_v3  ;;  %v965_v6 = vld [vmem:[%s483_s12 + $0x10] sm:$0xff]  ;;  %s448_s12 = scalar_lea.vmem [#allocation5], %s1149_s25  ;;  %s1348_s25 = scalar_lea.vmem %s1347_s28, 1024 }
  0x44   : > { %s1009_s26 = sshll.u32 %s448_s12, 4  ;;  %s1709_s26 = int_to_ptr.vmem [resolvable:$true] %s1009_s26 }
  0x45   : > { %s1342_s11 = scalar_lea.vmem %s1709_s26, 512  ;;  %p1349_p2 = scmp.lt.s32.totalorder %s1709_s26, %s1347_s28 }
  0x46   : > { %p1343_p6 = scmp.ne.s32.totalorder %s1709_s26, %s1342_s11  ;;  %p1350_p3 = scmp.lt.s32.totalorder %s1348_s25, %s1342_s11 }
  0x48   : > { %p1344_p10 = pnand %p1343_p6, %p1780_p9  ;;  %p1351_p4 = por %p1350_p3, %p1349_p2 }
  0x4a   : > { %p1345_p12 = pneg %p1344_p10 }
  0x4c   : > { %p1352_p7 = pnand %p1351_p4, %p1345_p12 }
  0x51   : > { %804 = vperm.xlu1 %1305, %v794_v49   ;;  %v866_v49 = vld [vmem:[%s1765_s6 + $0x78] sm:$0xff] }
  0x55   : > { %809 = vperm.xlu1 %1305, %v795_v50   ;;  %v874_v50 = vpack.c.bf16 %v866_v49, %v865_v48 }
  0x56   : > { %799 = vperm.xlu0 %1304, %v793_v51  }
  0x59   : > { %814 = vperm.xlu1 %1305, %v796_v53  }
  0x5a   : > { %946 = vperm.xlu0 %1304, %v936_v52  }
  0x5d   : > { %827 = vperm.xlu1 %1305, %v821_v55  }
  0x5e   : > { %956 = vperm.xlu0 %1304, %v938_v54  }
  0x61   : > { %832 = vperm.xlu1 %1305, %v822_v57  }
  0x62   : > { %974 = vperm.xlu0 %1304, %v964_v56   ;;  %v1166_v56 = vld [vmem:[%s1762_s3] ss:$0 sm:$0xff] }
  0x65   : > { %837 = vperm.xlu1 %1305, %v823_v59  }
  0x66   : > { %984 = vperm.xlu0 %1304, %v966_v58  }
  0x69   : > { %842 = vperm.xlu1 %1305, %v824_v60  }
  0x6d   : > { %941 = vperm.xlu1 %1305, %v935_v61  }
  0x71   : > { %951 = vperm.xlu1 %1305, %v937_v62  }
  0x75   : > { %969 = vperm.xlu1 %1305, %v963_v2  }
  0x79   : > { %979 = vperm.xlu1 %1305, %v965_v6  }
  0xc9   : > { %v504_v9 = vpop.xlane.xlu1 %503  ;;  %v498_v10 = vpop.xlane.xlu0 %497 }
  0xca   : > { %v510_v11 = vadd.f32 1.0, %v504_v9  ;;  %v508_v12 = vadd.f32 1.0, %v498_v10  ;;  %v857_v9 = vld [vmem:[%s1765_s6 + $0x30] sm:$0xff] }
  0xcc   : > { %v512_v13 = vadd.f32 1e-07, %v508_v12  ;;  %v514_v14 = vadd.f32 1e-07, %v510_v11  ;;  %v858_v11 = vld [vmem:[%s1765_s6 + $0x38] sm:$0xff] }
  0xcd   : > { %v507_v15 = vpop.xlane.xlu1 %506  ;;  %v501_v16 = vpop.xlane.xlu0 %500  ;;  %v870_v12 = vpack.c.bf16 %v858_v11, %v857_v9 }
  0xce   : > { %v511_v17 = vadd.f32 1.0, %v507_v15  ;;  %v509_v18 = vadd.f32 1.0, %v501_v16  ;;  %1306 = vrsqrt.f32 %v512_v13  ;;  %v859_v13 = vld [vmem:[%s1765_s6 + $0x40] sm:$0xff] }
  0xcf   : > { %1308 = vrsqrt.f32 %v514_v14  ;;  %v860_v14 = vld [vmem:[%s1765_s6 + $0x48] sm:$0xff] }
  0xd0   : > { %v515_v19 = vadd.f32 1e-07, %v511_v17  ;;  %v513_v20 = vadd.f32 1e-07, %v509_v18  ;;  %v871_v15 = vpack.c.bf16 %v860_v14, %v859_v13 }
  0xd1   : > { %v805_v51 = vpop.permute.xlu1 %804 }
  0xd2   : > { %1310 = vrsqrt.f32 %v515_v19 }
  0xd3   : > { %1312 = vrsqrt.f32 %v513_v20 }
  0xd5   : > { %v810_v52 = vpop.permute.xlu1 %809  ;;  %v800_v4 = vpop.permute.xlu0 %799 }
  0xd8   : > { %v1583_v22 = vpop.eup %1306 }
  0xd9   : > { %v1586_v23 = vmul.f32 %v1583_v22, %v491_v21  ;;  %v1588_v25 = vpop.eup %1308  ;;  %v815_v53 = vpop.permute.xlu1 %814 }
  0xda   : > { %v1608_v37 = vmul.f32 %v1588_v25, %v493_v31 }
  0xdb   : > { %v528_v28 = vpack.c.bf16 %v1586_v23, %v1586_v23 }
  0xdc   : > { %v1590_v27 = vpop.eup %1310  ;;  %v530_v41 = vpack.c.bf16 %v1608_v37, %v1608_v37 }
  0xdd   : > { %v1594_v29 = vpop.eup %1312  ;;  %v1597_v30 = vmul.f32 %v1590_v27, %v494_v24  ;;  %v537_v33 = vsel %vm535_vm2, %v528_v28, 0  ;;  %v828_v54 = vpop.permute.xlu1 %827 }
  0xde   : > { %v1601_v34 = vmul.f32 %v1594_v29, %v492_v26  ;;  %1198 = vmatpush3.bf16.msra.mxu0 %v537_v33  ;;  %v629_v43 = vsel %vm535_vm2, %v530_v41, 0 }
  0xdf   : > { %v531_v35 = vpack.c.bf16 %v1597_v30, %v1597_v30  ;;  %1203 = vmatprep.subr.bf16.mxu0 %v1413_v8 }
  0xe0   : > { %v529_v36 = vpack.c.bf16 %v1601_v34, %v1601_v34 }
  0xe1   : > { %v675_v39 = vsel %vm535_vm2, %v531_v35, 0  ;;  %1200 = vmatmul.mubr.msk.bf16.vlgmr.msra.gmra.mrb[0].mxu0 %vm495_vm0, %v524_v32  ;;  %v833_v55 = vpop.permute.xlu1 %832 }
  0xe2   : > { %v583_v40 = vsel %vm535_vm2, %v529_v36, 0  ;;  %1216 = vmatpush3.bf16.msra.mxu1 %v675_v39  ;;  %1205 = vmatprep.mubr.msk.bf16.mxu0 %vm1414_vm1, %v1413_v8 }
  0xe3   : > { %1204 = vmatpush3.bf16.msra.mxu0 %v583_v40  ;;  %1227 = vmatprep.subr.bf16.mxu1 %v867_v1 }
  0xe4   : > { %1209 = vmatprep.subr.bf16.mxu0 %v1413_v8 }
  0xe5   : > { %1218 = vmatmul.mubr.msk.bf16.vlgmr.msra.gmra.mrb[0].mxu1 %vm495_vm0, %v527_v38  ;;  %v838_v60 = vpop.permute.xlu1 %837 }
  0xe6   : > { %1228 = vmatpush3.bf16.msra.mxu1 %v867_v1 }
  0xe7   : > { %1229 = vmatprep.subr.bf16.mxu1 %v868_v5 }
  0xe9   : > { %1206 = vmatmul.mubr.msk.bf16.vlgmr.msra.gmra.mrb[4].mxu0 %vm495_vm0, %v525_v42 }
  0xea   : > { %1210 = vmatpush3.bf16.msra.mxu0 %v629_v43  ;;  %1211 = vmatprep.mubr.msk.bf16.mxu0 %vm1414_vm1, %v1413_v8  ;;  %v856_v8 = vld [vmem:[%s1765_s6 + $0x28] sm:$0xff] }
  0xeb   : > { %1221 = vmatprep.subr.bf16.mxu0 %v725_v47  ;;  %1230 = vmatpush3.bf16.msra.mxu1 %v868_v5  ;;  %v869_v10 = vpack.c.bf16 %v856_v8, %v855_v7 }
  0xed   : > { %1231 = vmatprep.subr.bf16.mxu1 %v869_v10 }
  0xef   : > { %1232 = vmatpush3.bf16.msra.mxu1 %v869_v10  ;;  %v843_v10 = vpop.permute.xlu1 %842 }
  0xf0   : > { %1233 = vmatprep.subr.bf16.mxu1 %v870_v12 }
  0xf1   : > { %1212 = vmatmul.mubr.msk.bf16.vlgmr.msra.gmra.mrb[8].mxu0 %vm495_vm0, %v526_v44 }
  0xf2   : > { %1222 = vmatpush3.bf16.msra.mxu0 %v725_v47 }
  0xf3   : > { %1234 = vmatpush3.bf16.msra.mxu1 %v870_v12 }
  0xf4   : > { %1235 = vmatprep.subr.bf16.mxu1 %v871_v15 }
  0xf7   : > { %1236 = vmatpush3.bf16.msra.mxu1 %v871_v15 }
 0x1b4   : > { %v573_v16 = vpop.f32.mrb[0].mxu0 }
 0x1b5   : > { %v1201_v17 = vpop.f32.mrb[1].mxu0  ;;  %v574_v28 = vadd.f32 %v573_v16, %v1586_v23 }
 0x1b6   : > { %v576_v18 = vpop.f32.mrb[2].mxu0 }
 0x1b7   : > { %v1202_v19 = vpop.f32.mrb[3].mxu0  ;;  %v717_v36 = vmul.f32 %v1583_v22, %v574_v28  ;;  %v861_v22 = vld [vmem:[%s1765_s6 + $0x50] sm:$0xff]  ;;  %v942_v18 = vpop.permute.xlu1 %941 }
 0x1b8   : > { %v711_v20 = vpop.f32.mrb[0].mxu1  ;;  %v947_v19 = vpop.permute.xlu0 %946 }
 0x1b9   : > { %v1219_v21 = vpop.f32.mrb[1].mxu1  ;;  %v712_v41 = vadd.f32 %v711_v20, %v1597_v30 }
 0x1ba   : > { %v714_v24 = vpop.f32.mrb[2].mxu1 }
 0x1bb   : > { %v1220_v26 = vpop.f32.mrb[3].mxu1  ;;  %v720_v45 = vmul.f32 %v1590_v27, %v712_v41  ;;  %v863_v27 = vld [vmem:[%s1765_s6 + $0x60] sm:$0xff]  ;;  %v952_v20 = vpop.permute.xlu1 %951 }
 0x1bc   : > { %v619_v31 = vpop.f32.mrb[4].mxu0  ;;  %v957_v21 = vpop.permute.xlu0 %956  ;;  %v1169_v24 = vld [vmem:[%s1766_s7] ss:$0 sm:$0xff] }
 0x1bd   : > { %v620_v32 = vadd.f32 %v619_v31, %v1601_v34  ;;  %v1207_v33 = vpop.f32.mrb[5].mxu0 }
 0x1be   : > { %v622_v35 = vpop.f32.mrb[6].mxu0 }
 0x1bf   : > { %v718_v38 = vmul.f32 %v1594_v29, %v620_v32  ;;  %v1208_v39 = vpop.f32.mrb[7].mxu0  ;;  %v862_v29 = vld [vmem:[%s1765_s6 + $0x58] sm:$0xff]  ;;  %v970_v26 = vpop.permute.xlu1 %969 }
 0x1c0   : > { %v872_v30 = vpack.c.bf16 %v862_v29, %v861_v22  ;;  %v975_v33 = vpop.permute.xlu0 %974 }
 0x1c1   : > { %v721_v40 = vpack.c.bf16 %v718_v38, %v717_v36 }
 0x1c2   : > { %1237 = vmatprep.subr.bf16.mxu1 %v872_v30 }
 0x1c3   : > { %1223 = vmatprep.mubr.msk.bf16.mxu0 %vm733_vm3, %v721_v40  ;;  %1238 = vmatpush3.bf16.msra.mxu1 %v872_v30 }
 0x1c4   : > { %v665_v42 = vpop.f32.mrb[8].mxu0  ;;  %v985_v22 = vpop.permute.xlu0 %984 }
 0x1c5   : > { %v666_v43 = vadd.f32 %v665_v42, %v1608_v37  ;;  %v1213_v44 = vpop.f32.mrb[9].mxu0 }
 0x1c6   : > { %v668_v23 = vpop.f32.mrb[10].mxu0 }
 0x1c7   : > { %v719_v34 = vmul.f32 %v1588_v25, %v666_v43  ;;  %v1214_v46 = vpop.f32.mrb[11].mxu0  ;;  %v864_v25 = vld [vmem:[%s1765_s6 + $0x68] sm:$0xff]  ;;  %v980_v23 = vpop.permute.xlu1 %979 }
 0x1c8   : > { %v873_v37 = vpack.c.bf16 %v864_v25, %v863_v27 }
 0x1c9   : > { %v722_v47 = vpack.c.bf16 %v720_v45, %v719_v34 }
 0x1ca   : > { %1239 = vmatprep.subr.bf16.mxu1 %v873_v37 }
 0x1cb   : > { %1224 = vmatmul.mubr.msk.bf16.vlgmr.msra.gmra.mrb[12].mxu0 %vm733_vm3, %v722_v47  ;;  %1240 = vmatpush3.bf16.msra.mxu1 %v873_v37 }
 0x1cc   : > { %1241 = vmatprep.subr.bf16.mxu1 %v874_v50 }
 0x1cf   : > { %1242 = vmatpush3.bf16.msra.mxu1 %v874_v50 }
 0x29e   : > { %v1225_v57 = vpop.f32.mrb[12].mxu0 }
 0x29f   : > { %v783_v58 = vadd.f32 %v1225_v57, %v1166_v56  ;;  %v774_v59 = vpop.f32.mrb[13].mxu0 }
 0x2a0   : > { %v775_v61 = vadd.f32 %v1166_v56, %v774_v59  ;;  %v1226_v62 = vpop.f32.mrb[14].mxu0 }
 0x2a1   : > { %v791_v63 = vmax.f32 %v783_v58, 0.0  ;;  %v786_v0 = vadd.f32 %v1226_v62, %v1166_v56  ;;  %v777_v1 = vpop.f32.mrb[15].mxu0 }
 0x2a2   : > { %v789_v2 = vmax.f32 %v775_v61, 0.0  ;;  %v778_v3 = vadd.f32 %v1166_v56, %v777_v1 }
 0x2a3   : > { %v819_v5 = vmul.f32 %v810_v52, %v791_v63  ;;  %v792_v6 = vmax.f32 %v786_v0, 0.0 }
 0x2a4   : > { %v817_v7 = vmul.f32 %v800_v4, %v789_v2  ;;  %v790_v8 = vmax.f32 %v778_v3, 0.0 }
 0x2a5   : > { %v820_v9 = vmul.f32 %v815_v53, %v792_v6  ;;  %v847_v12 = vadd.f32 %v838_v60, %v819_v5 }
 0x2a6   : > { %v818_v11 = vmul.f32 %v805_v51, %v790_v8  ;;  %v845_v14 = vadd.f32 %v828_v54, %v817_v7 }
 0x2a7   : > { %v848_v13 = vadd.f32 %v843_v10, %v820_v9 }
 0x2a8   : > { %v846_v15 = vadd.f32 %v833_v55, %v818_v11 }
 0x2a9   : > { %v850_v16 = vpack.c.bf16 %v848_v13, %v847_v12 }
 0x2aa   : > { %v849_v17 = vpack.c.bf16 %v846_v15, %v845_v14 }
 0x2ac   : > { %1243 = vmatprep.mubr.bf16.mxu1 %v849_v17 }
 0x2ad   : > { %1244 = vmatmul.mubr.bf16.vlgmr.msra.gmra.mrb[4].mxu1 %v850_v16 }
 0x380   : > { %v1245_v28 = vpop.f32.mrb[4].mxu1 }
 0x381   : > { %v925_v31 = vadd.f32 %v1245_v28, %v1169_v24  ;;  %v916_v32 = vpop.f32.mrb[5].mxu1 }
 0x382   : > { %v917_v35 = vadd.f32 %v1169_v24, %v916_v32  ;;  %v1246_v36 = vpop.f32.mrb[6].mxu1 }
 0x383   : > { %v933_v38 = vmax.f32 %v925_v31, 0.0  ;;  %v928_v39 = vadd.f32 %v1246_v36, %v1169_v24  ;;  %v919_v40 = vpop.f32.mrb[7].mxu1 }
 0x384   : > { %v931_v41 = vmax.f32 %v917_v35, 0.0  ;;  %v920_v42 = vadd.f32 %v1169_v24, %v919_v40 }
 0x385   : > { %v961_v43 = vmul.f32 %v952_v20, %v933_v38  ;;  %v934_v44 = vmax.f32 %v928_v39, 0.0 }
 0x386   : > { %v959_v45 = vmul.f32 %v942_v18, %v931_v41  ;;  %v932_v34 = vmax.f32 %v920_v42, 0.0 }
 0x387   : > { %v989_v46 = vadd.f32 %v980_v23, %v961_v43  ;;  %v962_v47 = vmul.f32 %v957_v21, %v934_v44 }
 0x388   : > { %v987_v29 = vadd.f32 %v970_v26, %v959_v45  ;;  %v960_v30 = vmul.f32 %v947_v19, %v932_v34 }
 0x389   : > { %993 = vst [vmem:[%s448_s12 + $0x10] sm:$0xff] %v989_v46  ;;  %v990_v27 = vadd.f32 %v985_v22, %v962_v47 }
 0x38a   : > { %991 = vst [vmem:[%s448_s12] sm:$0xff] %v987_v29  ;;  %v988_v25 = vadd.f32 %v975_v33, %v960_v30 }
 0x38b   : > { %994 = vst [vmem:[%s448_s12 + $0x18] sm:$0xff] %v990_v27 }
 0x38c   : > { %992 = vst [vmem:[%s448_s12 + $0x8] sm:$0xff] %v988_v25 }
 0x38d   : > { %1355 = shalt.err (!%p1352_p7)
}
 0x38e   : > { %s1356_s27 = scalar_lea.hbm %s1714_s18, 512  ;;  %s1360_s21 = scalar_lea.hbm %s1769_s10, 1024 }
 0x38f   : > { %p1357_p8 = scmp.ne.s32.totalorder %s1714_s18, %s1356_s27  ;;  %p1361_p1 = scmp.lt.u32.totalorder %s1714_s18, %s1769_s10 }
 0x390   : > { %p1362_p0 = scmp.lt.u32.totalorder %s1360_s21, %s1356_s27  ;;  %p1364_p6 = scmp.lt.u32.totalorder %s1356_s27, %s1714_s18 }
 0x391   : > { %p1358_p11 = pnand %p1357_p8, %p1780_p9 }
 0x392   : > { %p1363_p5 = por %p1362_p0, %p1361_p1 }
 0x393   : > { %p1359_p13 = pneg %p1358_p11 }
 0x394   : > { %p1365_p10 = por %p1364_p6, %p1363_p5 }
 0x396   : > { %p1366_p12 = pnand %p1365_p10, %p1359_p13 }
 0x398   : > { %1369 = shalt.err (!%p1366_p12)
}
 0x399   : > { %s1417_s11 = smov 128   ;;  %s1418_s28 = smov 8  }
 0x39a   : > { %1251 = dma.vmem_to_hbm [thread:$0]  (%p1780_p9), %s1709_s26, 512, %s1714_s18, %s1718_s17, %s1417_s11, %s1417_s11, %s1418_s28  }
 0x39b PF: > { %p1263_p2 = scmp.ge.s32.totalorder %s1408_s16, 2  ;;  %s1024_s25 = sand.u32 1, %s1396_s13  }
 0x39c   : > { %p1781_p3 = scmp.ne.s32.totalorder %s1774_s24, 0  ;;  %s1025_s27 = scalar_lea.sflag [#allocation4], %s1024_s25 }
 0x39e   : > { %p1258_p4 = pnand %p1263_p2, %p1781_p3 }
 0x3a0   : > { %1391 = dma.done.wait (!%p1258_p4), %s1025_s27, 512  }
 0x3a1   : > { %1393 = vsyncadd (!%p1258_p4), %s1025_s27, 4294966784  ;;  %p21_p7 = scmp.ge.s32.totalorder %s1499_s19, 4   ;;  %s1782_s13 = smov %s1400_s14 }
 0x3a2   : > { %s1783_s14 = smov %s1404_s15  ;;  %s1784_s15 = smov %s1510_s22 }
 0x3a3   : > { %s1785_s16 = smov %s1499_s19  ;;  %23 = sbr.rel (!%p21_p7) target bundleno = 4 (0x4), region = 115 }
 0x3aa   :  { %1030 = vsyncpa [#allocation3], 1 }
 0x3ab   :  { %1032 = vsyncpa [#allocation3 + $0x1], 1 }
 0x3ac   :  { %1033 = vsyncpa [#allocation4], 1 }
 0x3ad   :  { %1035 = vsyncpa [#allocation4 + $0x1], 1 }

</bundles_post_ra>
